<compile_context>
chip_gen: v7x
topology: tpu7x:2x2x1
jax: 0.10.0
libtpu: 0.0.40
codegen_flags: <defaults>
</compile_context>

<pallas_src>
import math

import jax
import jax.numpy as jnp
from jax.experimental import pallas as pl
from jax.experimental.pallas import tpu as pltpu  # noqa: F401  (kept for easy CompilerParams tweaks)

# ---------------- configuration (small, consistent with the module) ----------------
B = 2          # batch
N = 16         # sequence length
DIM = 32       # model dim
HEADS = 2      # n_heads
DHEAD = 16     # d_head
INNER = HEADS * DHEAD      # = 32
FF = DIM * 4               # = 128
EPS = 1e-5                 # nn.LayerNorm default eps
ROWS = B * N               # batch folded into rows


def _layernorm(x, gamma):
    # PyTorch nn.LayerNorm(dim, bias=False): biased variance over last dim, affine weight only.
    mu = jnp.mean(x, axis=-1, keepdims=True)
    var = jnp.mean((x - mu) ** 2, axis=-1, keepdims=True)
    return (x - mu) * jax.lax.rsqrt(var + EPS) * gamma


def _gelu_exact(x):
    # nn.GELU() default = exact erf formulation.
    return 0.5 * x * (1.0 + jax.lax.erf(x * (1.0 / math.sqrt(2.0))))


def transformer_block_kernel(x_ref, g1_ref, wqkv_ref, wo_ref, g2_ref,
                             w1_ref, w2_ref, out_ref):
    # x_ref: (B*N, DIM) — batch already folded into rows by the wrapper.
    x = x_ref[...].astype(jnp.float32)            # (B*N, D)
    g1 = g1_ref[...].astype(jnp.float32)          # (1, D), broadcasts over rows
    g2 = g2_ref[...].astype(jnp.float32)          # (1, D)

    # ---- norm1 (whole batch at once) ----
    ln1 = _layernorm(x, g1)                       # (B*N, D)

    # ---- fused QKV projection: one (B*N, D) x (D, 3*INNER) MXU push ----
    qkv = jnp.dot(ln1, wqkv_ref[...], preferred_element_type=jnp.float32)  # (B*N, 3*INNER)
    q = qkv[:, :INNER]
    k = qkv[:, INNER:2 * INNER]
    v = qkv[:, 2 * INNER:]

    # ---- multi-head self attention per (batch, head)
    #      (memory_efficient_attention semantics: softmax(q k^T / sqrt(d_head)) v,
    #       no mask, no dropout) ----
    scale = 1.0 / math.sqrt(DHEAD)
    batch_outs = []
    for b in range(B):
        r0, r1 = b * N, (b + 1) * N
        per_head = []
        for h in range(HEADS):
            c0, c1 = h * DHEAD, (h + 1) * DHEAD
            qh = q[r0:r1, c0:c1]                  # (N, dh) — static value slices
            kh = k[r0:r1, c0:c1]
            vh = v[r0:r1, c0:c1]

            s = jnp.dot(qh, kh.T, preferred_element_type=jnp.float32) * scale  # (N, N)
            s = s - jnp.max(s, axis=-1, keepdims=True)
            p = jnp.exp(s)
            # approx reciprocal -> EUP slot (vrcp); tiny numerics delta vs exact divide.
            p = p * pl.reciprocal(jnp.sum(p, axis=-1, keepdims=True), approx=True)

            per_head.append(jnp.dot(p, vh, preferred_element_type=jnp.float32))  # (N, dh)
        batch_outs.append(jnp.concatenate(per_head, axis=-1))   # (N, INNER), heads in (h d) order
    attn = jnp.concatenate(batch_outs, axis=0)                  # (B*N, INNER)

    # ---- single output projection for all batches/heads ----
    sa = jnp.dot(attn, wo_ref[...], preferred_element_type=jnp.float32)  # (B*N, D)

    x1 = x + sa                                   # residual 1

    # ---- norm2 + feed-forward (Linear -> GELU -> Linear, no bias), whole batch at once ----
    ln2 = _layernorm(x1, g2)
    hdn = jnp.dot(ln2, w1_ref[...], preferred_element_type=jnp.float32)  # (B*N, 4D)
    hdn = _gelu_exact(hdn)
    ffo = jnp.dot(hdn, w2_ref[...], preferred_element_type=jnp.float32)  # (B*N, D)

    out_ref[...] = (x1 + ffo).astype(out_ref.dtype)


def basic_transformer_block(x, params):
    g1, wq, wk, wv, wo, g2, w1, w2 = params
    # Fuse the three QKV projection weights into one (D, 3*INNER) matrix (wrapper-side, free).
    wqkv = jnp.concatenate([wq, wk, wv], axis=1)
    # Fold batch into the row axis -> single kernel invocation, no grid, no pipelining machinery.
    x2d = x.reshape(ROWS, DIM)
    out2d = pl.pallas_call(
        transformer_block_kernel,
        out_shape=jax.ShapeDtypeStruct((ROWS, DIM), jnp.float32),
    )(x2d, g1, wqkv, wo, g2, w1, w2)
    return out2d.reshape(B, N, DIM)


def reference(x, params):
    """Pure-JAX reference of the PyTorch forward pass (for validation)."""
    g1, wq, wk, wv, wo, g2, w1, w2 = params

    def ln(v, g):
        mu = jnp.mean(v, -1, keepdims=True)
        var = jnp.mean((v - mu) ** 2, -1, keepdims=True)
        return (v - mu) / jnp.sqrt(var + EPS) * g

    ln1 = ln(x, g1[0])
    q = ln1 @ wq
    k = ln1 @ wk
    v = ln1 @ wv

    def split(t):  # (B,N,H*dh) -> (B,H,N,dh)
        return t.reshape(B, N, HEADS, DHEAD).transpose(0, 2, 1, 3)

    qh, kh, vh = split(q), split(k), split(v)
    s = jnp.einsum('bhqd,bhkd->bhqk', qh, kh) / math.sqrt(DHEAD)
    p = jax.nn.softmax(s, axis=-1)
    o = jnp.einsum('bhqk,bhkd->bhqd', p, vh).transpose(0, 2, 1, 3).reshape(B, N, INNER)
    x1 = x + o @ wo
    ln2 = ln(x1, g2[0])
    h = ln2 @ w1
    h = 0.5 * h * (1.0 + jax.lax.erf(h / jnp.sqrt(2.0)))
    return x1 + h @ w2


if __name__ == "__main__":
    key = jax.random.PRNGKey(0)
    ks = jax.random.split(key, 9)

    x = jax.random.normal(ks[0], (B, N, DIM), jnp.float32)

    # Deterministic parameter init (synthetic; shapes follow the module's __init__).
    g1 = 1.0 + 0.02 * jax.random.normal(ks[1], (1, DIM), jnp.float32)
    wq = 0.05 * jax.random.normal(ks[2], (DIM, INNER), jnp.float32)
    wk = 0.05 * jax.random.normal(ks[3], (DIM, INNER), jnp.float32)
    wv = 0.05 * jax.random.normal(ks[4], (DIM, INNER), jnp.float32)
    wo = 0.05 * jax.random.normal(ks[5], (INNER, DIM), jnp.float32)
    g2 = 1.0 + 0.02 * jax.random.normal(ks[6], (1, DIM), jnp.float32)
    w1 = 0.05 * jax.random.normal(ks[7], (DIM, FF), jnp.float32)
    w2 = 0.05 * jax.random.normal(ks[8], (FF, DIM), jnp.float32)

    params = (g1, wq, wk, wv, wo, g2, w1, w2)

    out = basic_transformer_block(x, params)
    out = jax.block_until_ready(out)

    ref = reference(x, params)
    assert out.shape == (B, N, DIM)
    # Tolerance loosened 1e-4 -> 2e-3 because the softmax denominator uses the EUP
    # approximate reciprocal (pl.reciprocal(..., approx=True)).
    assert jnp.allclose(out, ref, atol=2e-3, rtol=2e-3), (
        f"max abs err {jnp.max(jnp.abs(out - ref))}")

    print("KERNEL_OK")
</pallas_src>

<mosaic_0001>
module attributes {stable_mosaic.version = 11 : i64} {
  func.func @transformer_block_kernel(%arg0: memref<32x32xf32, #tpu.memory_space<vmem>>, %arg1: memref<1x32xf32, #tpu.memory_space<vmem>>, %arg2: memref<32x96xf32, #tpu.memory_space<vmem>>, %arg3: memref<32x32xf32, #tpu.memory_space<vmem>>, %arg4: memref<1x32xf32, #tpu.memory_space<vmem>>, %arg5: memref<32x128xf32, #tpu.memory_space<vmem>>, %arg6: memref<128x32xf32, #tpu.memory_space<vmem>>, %arg7: memref<32x32xf32, #tpu.memory_space<vmem>>) attributes {dimension_semantics = [], scalar_prefetch = 0 : i64, scratch_operands = 0 : i64, tpu.core_type = #tpu.core_type<tc>} {
    %c0 = arith.constant 0 : index
    %c0_0 = arith.constant 0 : index
    %0 = vector.load %arg0[%c0, %c0_0] : memref<32x32xf32, #tpu.memory_space<vmem>>, vector<32x32xf32>
    %c0_1 = arith.constant 0 : index
    %c0_2 = arith.constant 0 : index
    %1 = vector.load %arg1[%c0_1, %c0_2] : memref<1x32xf32, #tpu.memory_space<vmem>>, vector<1x32xf32>
    %c0_3 = arith.constant 0 : index
    %c0_4 = arith.constant 0 : index
    %2 = vector.load %arg4[%c0_3, %c0_4] : memref<1x32xf32, #tpu.memory_space<vmem>>, vector<1x32xf32>
    %cst = arith.constant dense<0.000000e+00> : vector<32xf32>
    %3 = vector.multi_reduction <add>, %0, %cst [1] : vector<32x32xf32> to vector<32xf32>
    %4 = vector.shape_cast %3 : vector<32xf32> to vector<32x1xf32>
    %cst_5 = arith.constant 3.200000e+01 : f32
    %5 = vector.broadcast %cst_5 : f32 to vector<32x1xf32>
    %6 = arith.divf %4, %5 : vector<32x1xf32>
    %7 = vector.broadcast %6 : vector<32x1xf32> to vector<32x32xf32>
    %8 = arith.subf %0, %7 : vector<32x32xf32>
    %9 = arith.mulf %8, %8 : vector<32x32xf32>
    %cst_6 = arith.constant dense<0.000000e+00> : vector<32xf32>
    %10 = vector.multi_reduction <add>, %9, %cst_6 [1] : vector<32x32xf32> to vector<32xf32>
    %11 = vector.shape_cast %10 : vector<32xf32> to vector<32x1xf32>
    %cst_7 = arith.constant 3.200000e+01 : f32
    %12 = vector.broadcast %cst_7 : f32 to vector<32x1xf32>
    %13 = arith.divf %11, %12 : vector<32x1xf32>
    %14 = vector.broadcast %6 : vector<32x1xf32> to vector<32x32xf32>
    %15 = arith.subf %0, %14 : vector<32x32xf32>
    %cst_8 = arith.constant 9.99999974E-6 : f32
    %16 = vector.broadcast %cst_8 : f32 to vector<32x1xf32>
    %17 = arith.addf %13, %16 : vector<32x1xf32>
    %18 = math.rsqrt %17 : vector<32x1xf32>
    %19 = vector.broadcast %18 : vector<32x1xf32> to vector<32x32xf32>
    %20 = arith.mulf %15, %19 : vector<32x32xf32>
    %21 = vector.broadcast %1 : vector<1x32xf32> to vector<32x32xf32>
    %22 = arith.mulf %20, %21 : vector<32x32xf32>
    %c0_9 = arith.constant 0 : index
    %c0_10 = arith.constant 0 : index
    %23 = vector.load %arg2[%c0_9, %c0_10] : memref<32x96xf32, #tpu.memory_space<vmem>>, vector<32x96xf32>
    %cst_11 = arith.constant dense<0.000000e+00> : vector<32x96xf32>
    %24 = tpu.matmul %22, %23, %cst_11 {dimension_numbers = #tpu.dot_dimension_numbers<[1], [0], [0], [1], [0, 0, 1, 1], [], []>} : vector<32x32xf32>, vector<32x96xf32>, vector<32x96xf32> -> vector<32x96xf32>
    %25 = vector.extract_strided_slice %24 {offsets = [0, 0], sizes = [32, 32], strides = [1, 1]} : vector<32x96xf32> to vector<32x32xf32>
    %26 = vector.extract_strided_slice %24 {offsets = [0, 32], sizes = [32, 32], strides = [1, 1]} : vector<32x96xf32> to vector<32x32xf32>
    %27 = vector.extract_strided_slice %24 {offsets = [0, 64], sizes = [32, 32], strides = [1, 1]} : vector<32x96xf32> to vector<32x32xf32>
    %28 = vector.extract_strided_slice %25 {offsets = [0, 0], sizes = [16, 16], strides = [1, 1]} : vector<32x32xf32> to vector<16x16xf32>
    %29 = vector.extract_strided_slice %26 {offsets = [0, 0], sizes = [16, 16], strides = [1, 1]} : vector<32x32xf32> to vector<16x16xf32>
    %30 = vector.extract_strided_slice %27 {offsets = [0, 0], sizes = [16, 16], strides = [1, 1]} : vector<32x32xf32> to vector<16x16xf32>
    %31 = tpu.transpose %29, [1, 0] : vector<16x16xf32> -> vector<16x16xf32>
    %cst_12 = arith.constant dense<0.000000e+00> : vector<16x16xf32>
    %32 = tpu.matmul %28, %31, %cst_12 {dimension_numbers = #tpu.dot_dimension_numbers<[1], [0], [0], [1], [0, 0, 1, 1], [], []>} : vector<16x16xf32>, vector<16x16xf32>, vector<16x16xf32> -> vector<16x16xf32>
    %cst_13 = arith.constant 2.500000e-01 : f32
    %33 = vector.broadcast %cst_13 : f32 to vector<16x16xf32>
    %34 = arith.mulf %32, %33 : vector<16x16xf32>
    %cst_14 = arith.constant dense<0xFF800000> : vector<16xf32>
    %35 = vector.multi_reduction <maximumf>, %34, %cst_14 [1] : vector<16x16xf32> to vector<16xf32>
    %36 = vector.shape_cast %35 : vector<16xf32> to vector<16x1xf32>
    %37 = vector.broadcast %36 : vector<16x1xf32> to vector<16x16xf32>
    %38 = arith.subf %34, %37 : vector<16x16xf32>
    %39 = math.exp %38 : vector<16x16xf32>
    %cst_15 = arith.constant dense<0.000000e+00> : vector<16xf32>
    %40 = vector.multi_reduction <add>, %39, %cst_15 [1] : vector<16x16xf32> to vector<16xf32>
    %41 = vector.shape_cast %40 : vector<16xf32> to vector<16x1xf32>
    %42 = tpu.reciprocal %41 {approx = true} : vector<16x1xf32> -> vector<16x1xf32>
    %43 = vector.broadcast %42 : vector<16x1xf32> to vector<16x16xf32>
    %44 = arith.mulf %39, %43 : vector<16x16xf32>
    %cst_16 = arith.constant dense<0.000000e+00> : vector<16x16xf32>
    %45 = tpu.matmul %44, %30, %cst_16 {dimension_numbers = #tpu.dot_dimension_numbers<[1], [0], [0], [1], [0, 0, 1, 1], [], []>} : vector<16x16xf32>, vector<16x16xf32>, vector<16x16xf32> -> vector<16x16xf32>
    %46 = vector.extract_strided_slice %25 {offsets = [0, 16], sizes = [16, 16], strides = [1, 1]} : vector<32x32xf32> to vector<16x16xf32>
    %47 = vector.extract_strided_slice %26 {offsets = [0, 16], sizes = [16, 16], strides = [1, 1]} : vector<32x32xf32> to vector<16x16xf32>
    %48 = vector.extract_strided_slice %27 {offsets = [0, 16], sizes = [16, 16], strides = [1, 1]} : vector<32x32xf32> to vector<16x16xf32>
    %49 = tpu.transpose %47, [1, 0] : vector<16x16xf32> -> vector<16x16xf32>
    %cst_17 = arith.constant dense<0.000000e+00> : vector<16x16xf32>
    %50 = tpu.matmul %46, %49, %cst_17 {dimension_numbers = #tpu.dot_dimension_numbers<[1], [0], [0], [1], [0, 0, 1, 1], [], []>} : vector<16x16xf32>, vector<16x16xf32>, vector<16x16xf32> -> vector<16x16xf32>
    %cst_18 = arith.constant 2.500000e-01 : f32
    %51 = vector.broadcast %cst_18 : f32 to vector<16x16xf32>
    %52 = arith.mulf %50, %51 : vector<16x16xf32>
    %cst_19 = arith.constant dense<0xFF800000> : vector<16xf32>
    %53 = vector.multi_reduction <maximumf>, %52, %cst_19 [1] : vector<16x16xf32> to vector<16xf32>
    %54 = vector.shape_cast %53 : vector<16xf32> to vector<16x1xf32>
    %55 = vector.broadcast %54 : vector<16x1xf32> to vector<16x16xf32>
    %56 = arith.subf %52, %55 : vector<16x16xf32>
    %57 = math.exp %56 : vector<16x16xf32>
    %cst_20 = arith.constant dense<0.000000e+00> : vector<16xf32>
    %58 = vector.multi_reduction <add>, %57, %cst_20 [1] : vector<16x16xf32> to vector<16xf32>
    %59 = vector.shape_cast %58 : vector<16xf32> to vector<16x1xf32>
    %60 = tpu.reciprocal %59 {approx = true} : vector<16x1xf32> -> vector<16x1xf32>
    %61 = vector.broadcast %60 : vector<16x1xf32> to vector<16x16xf32>
    %62 = arith.mulf %57, %61 : vector<16x16xf32>
    %cst_21 = arith.constant dense<0.000000e+00> : vector<16x16xf32>
    %63 = tpu.matmul %62, %48, %cst_21 {dimension_numbers = #tpu.dot_dimension_numbers<[1], [0], [0], [1], [0, 0, 1, 1], [], []>} : vector<16x16xf32>, vector<16x16xf32>, vector<16x16xf32> -> vector<16x16xf32>
    %64 = tpu.concatenate %45, %63 in 1 : vector<16x16xf32>, vector<16x16xf32> -> vector<16x32xf32>
    %65 = vector.extract_strided_slice %25 {offsets = [16, 0], sizes = [16, 16], strides = [1, 1]} : vector<32x32xf32> to vector<16x16xf32>
    %66 = vector.extract_strided_slice %26 {offsets = [16, 0], sizes = [16, 16], strides = [1, 1]} : vector<32x32xf32> to vector<16x16xf32>
    %67 = vector.extract_strided_slice %27 {offsets = [16, 0], sizes = [16, 16], strides = [1, 1]} : vector<32x32xf32> to vector<16x16xf32>
    %68 = tpu.transpose %66, [1, 0] : vector<16x16xf32> -> vector<16x16xf32>
    %cst_22 = arith.constant dense<0.000000e+00> : vector<16x16xf32>
    %69 = tpu.matmul %65, %68, %cst_22 {dimension_numbers = #tpu.dot_dimension_numbers<[1], [0], [0], [1], [0, 0, 1, 1], [], []>} : vector<16x16xf32>, vector<16x16xf32>, vector<16x16xf32> -> vector<16x16xf32>
    %cst_23 = arith.constant 2.500000e-01 : f32
    %70 = vector.broadcast %cst_23 : f32 to vector<16x16xf32>
    %71 = arith.mulf %69, %70 : vector<16x16xf32>
    %cst_24 = arith.constant dense<0xFF800000> : vector<16xf32>
    %72 = vector.multi_reduction <maximumf>, %71, %cst_24 [1] : vector<16x16xf32> to vector<16xf32>
    %73 = vector.shape_cast %72 : vector<16xf32> to vector<16x1xf32>
    %74 = vector.broadcast %73 : vector<16x1xf32> to vector<16x16xf32>
    %75 = arith.subf %71, %74 : vector<16x16xf32>
    %76 = math.exp %75 : vector<16x16xf32>
    %cst_25 = arith.constant dense<0.000000e+00> : vector<16xf32>
    %77 = vector.multi_reduction <add>, %76, %cst_25 [1] : vector<16x16xf32> to vector<16xf32>
    %78 = vector.shape_cast %77 : vector<16xf32> to vector<16x1xf32>
    %79 = tpu.reciprocal %78 {approx = true} : vector<16x1xf32> -> vector<16x1xf32>
    %80 = vector.broadcast %79 : vector<16x1xf32> to vector<16x16xf32>
    %81 = arith.mulf %76, %80 : vector<16x16xf32>
    %cst_26 = arith.constant dense<0.000000e+00> : vector<16x16xf32>
    %82 = tpu.matmul %81, %67, %cst_26 {dimension_numbers = #tpu.dot_dimension_numbers<[1], [0], [0], [1], [0, 0, 1, 1], [], []>} : vector<16x16xf32>, vector<16x16xf32>, vector<16x16xf32> -> vector<16x16xf32>
    %83 = vector.extract_strided_slice %25 {offsets = [16, 16], sizes = [16, 16], strides = [1, 1]} : vector<32x32xf32> to vector<16x16xf32>
    %84 = vector.extract_strided_slice %26 {offsets = [16, 16], sizes = [16, 16], strides = [1, 1]} : vector<32x32xf32> to vector<16x16xf32>
    %85 = vector.extract_strided_slice %27 {offsets = [16, 16], sizes = [16, 16], strides = [1, 1]} : vector<32x32xf32> to vector<16x16xf32>
    %86 = tpu.transpose %84, [1, 0] : vector<16x16xf32> -> vector<16x16xf32>
    %cst_27 = arith.constant dense<0.000000e+00> : vector<16x16xf32>
    %87 = tpu.matmul %83, %86, %cst_27 {dimension_numbers = #tpu.dot_dimension_numbers<[1], [0], [0], [1], [0, 0, 1, 1], [], []>} : vector<16x16xf32>, vector<16x16xf32>, vector<16x16xf32> -> vector<16x16xf32>
    %cst_28 = arith.constant 2.500000e-01 : f32
    %88 = vector.broadcast %cst_28 : f32 to vector<16x16xf32>
    %89 = arith.mulf %87, %88 : vector<16x16xf32>
    %cst_29 = arith.constant dense<0xFF800000> : vector<16xf32>
    %90 = vector.multi_reduction <maximumf>, %89, %cst_29 [1] : vector<16x16xf32> to vector<16xf32>
    %91 = vector.shape_cast %90 : vector<16xf32> to vector<16x1xf32>
    %92 = vector.broadcast %91 : vector<16x1xf32> to vector<16x16xf32>
    %93 = arith.subf %89, %92 : vector<16x16xf32>
    %94 = math.exp %93 : vector<16x16xf32>
    %cst_30 = arith.constant dense<0.000000e+00> : vector<16xf32>
    %95 = vector.multi_reduction <add>, %94, %cst_30 [1] : vector<16x16xf32> to vector<16xf32>
    %96 = vector.shape_cast %95 : vector<16xf32> to vector<16x1xf32>
    %97 = tpu.reciprocal %96 {approx = true} : vector<16x1xf32> -> vector<16x1xf32>
    %98 = vector.broadcast %97 : vector<16x1xf32> to vector<16x16xf32>
    %99 = arith.mulf %94, %98 : vector<16x16xf32>
    %cst_31 = arith.constant dense<0.000000e+00> : vector<16x16xf32>
    %100 = tpu.matmul %99, %85, %cst_31 {dimension_numbers = #tpu.dot_dimension_numbers<[1], [0], [0], [1], [0, 0, 1, 1], [], []>} : vector<16x16xf32>, vector<16x16xf32>, vector<16x16xf32> -> vector<16x16xf32>
    %101 = tpu.concatenate %82, %100 in 1 : vector<16x16xf32>, vector<16x16xf32> -> vector<16x32xf32>
    %102 = tpu.concatenate %64, %101 in 0 : vector<16x32xf32>, vector<16x32xf32> -> vector<32x32xf32>
    %c0_32 = arith.constant 0 : index
    %c0_33 = arith.constant 0 : index
    %103 = vector.load %arg3[%c0_32, %c0_33] : memref<32x32xf32, #tpu.memory_space<vmem>>, vector<32x32xf32>
    %cst_34 = arith.constant dense<0.000000e+00> : vector<32x32xf32>
    %104 = tpu.matmul %102, %103, %cst_34 {dimension_numbers = #tpu.dot_dimension_numbers<[1], [0], [0], [1], [0, 0, 1, 1], [], []>} : vector<32x32xf32>, vector<32x32xf32>, vector<32x32xf32> -> vector<32x32xf32>
    %105 = arith.addf %0, %104 : vector<32x32xf32>
    %cst_35 = arith.constant dense<0.000000e+00> : vector<32xf32>
    %106 = vector.multi_reduction <add>, %105, %cst_35 [1] : vector<32x32xf32> to vector<32xf32>
    %107 = vector.shape_cast %106 : vector<32xf32> to vector<32x1xf32>
    %cst_36 = arith.constant 3.200000e+01 : f32
    %108 = vector.broadcast %cst_36 : f32 to vector<32x1xf32>
    %109 = arith.divf %107, %108 : vector<32x1xf32>
    %110 = vector.broadcast %109 : vector<32x1xf32> to vector<32x32xf32>
    %111 = arith.subf %105, %110 : vector<32x32xf32>
    %112 = arith.mulf %111, %111 : vector<32x32xf32>
    %cst_37 = arith.constant dense<0.000000e+00> : vector<32xf32>
    %113 = vector.multi_reduction <add>, %112, %cst_37 [1] : vector<32x32xf32> to vector<32xf32>
    %114 = vector.shape_cast %113 : vector<32xf32> to vector<32x1xf32>
    %cst_38 = arith.constant 3.200000e+01 : f32
    %115 = vector.broadcast %cst_38 : f32 to vector<32x1xf32>
    %116 = arith.divf %114, %115 : vector<32x1xf32>
    %117 = vector.broadcast %109 : vector<32x1xf32> to vector<32x32xf32>
    %118 = arith.subf %105, %117 : vector<32x32xf32>
    %cst_39 = arith.constant 9.99999974E-6 : f32
    %119 = vector.broadcast %cst_39 : f32 to vector<32x1xf32>
    %120 = arith.addf %116, %119 : vector<32x1xf32>
    %121 = math.rsqrt %120 : vector<32x1xf32>
    %122 = vector.broadcast %121 : vector<32x1xf32> to vector<32x32xf32>
    %123 = arith.mulf %118, %122 : vector<32x32xf32>
    %124 = vector.broadcast %2 : vector<1x32xf32> to vector<32x32xf32>
    %125 = arith.mulf %123, %124 : vector<32x32xf32>
    %c0_40 = arith.constant 0 : index
    %c0_41 = arith.constant 0 : index
    %126 = vector.load %arg5[%c0_40, %c0_41] : memref<32x128xf32, #tpu.memory_space<vmem>>, vector<32x128xf32>
    %cst_42 = arith.constant dense<0.000000e+00> : vector<32x128xf32>
    %127 = tpu.matmul %125, %126, %cst_42 {dimension_numbers = #tpu.dot_dimension_numbers<[1], [0], [0], [1], [0, 0, 1, 1], [], []>} : vector<32x32xf32>, vector<32x128xf32>, vector<32x128xf32> -> vector<32x128xf32>
    %cst_43 = arith.constant 5.000000e-01 : f32
    %128 = vector.broadcast %cst_43 : f32 to vector<32x128xf32>
    %129 = arith.mulf %128, %127 : vector<32x128xf32>
    %cst_44 = arith.constant 0.707106769 : f32
    %130 = vector.broadcast %cst_44 : f32 to vector<32x128xf32>
    %131 = arith.mulf %127, %130 : vector<32x128xf32>
    %132 = math.erf %131 : vector<32x128xf32>
    %cst_45 = arith.constant 1.000000e+00 : f32
    %133 = vector.broadcast %cst_45 : f32 to vector<32x128xf32>
    %134 = arith.addf %133, %132 : vector<32x128xf32>
    %135 = arith.mulf %129, %134 : vector<32x128xf32>
    %c0_46 = arith.constant 0 : index
    %c0_47 = arith.constant 0 : index
    %136 = vector.load %arg6[%c0_46, %c0_47] : memref<128x32xf32, #tpu.memory_space<vmem>>, vector<128x32xf32>
    %cst_48 = arith.constant dense<0.000000e+00> : vector<32x32xf32>
    %137 = tpu.matmul %135, %136, %cst_48 {dimension_numbers = #tpu.dot_dimension_numbers<[1], [0], [0], [1], [0, 0, 1, 1], [], []>} : vector<32x128xf32>, vector<128x32xf32>, vector<32x32xf32> -> vector<32x32xf32>
    %138 = arith.addf %105, %137 : vector<32x32xf32>
    %c0_49 = arith.constant 0 : index
    %c0_50 = arith.constant 0 : index
    %139 = vector.load %arg7[%c0_49, %c0_50] : memref<32x32xf32, #tpu.memory_space<vmem>>, vector<32x32xf32>
    tpu.vector_store %arg7[%c0_49, %c0_50], %138 {strides = array<i32>} : memref<32x32xf32, #tpu.memory_space<vmem>>, vector<32x32xf32>,
    return
  }
}

</mosaic_0001>

<bundles_post_ra>
// kernel: tpu_custom_call.1
= control target key start
LH: loop header
LB: loop body
LE: loop exit
PB: predicated region body
PF: predicated region fallthrough
CT: control target
= control target key end

     0   :  { %vm33_vm0 = vcmask 261120   ;;  %s2267_s0 = inlined_call_operand.vmem [shape: f32[32,32], index: 0, kind: input, shape index: {}]   ;;  %s2268_s1 = inlined_call_operand.vmem [shape: f32[1,32], index: 1, kind: input, shape index: {}]   ;;  %s2269_s2 = inlined_call_operand.vmem [shape: f32[32,96], index: 2, kind: input, shape index: {}]   ;;  %s2270_s3 = inlined_call_operand.vmem [shape: f32[32,32], index: 3, kind: input, shape index: {}]   ;;  %s2271_s4 = inlined_call_operand.vmem [shape: f32[1,32], index: 4, kind: input, shape index: {}]   ;;  %s2272_s5 = inlined_call_operand.vmem [shape: f32[32,128], index: 5, kind: input, shape index: {}]   ;;  %s2273_s6 = inlined_call_operand.vmem [shape: f32[128,32], index: 6, kind: input, shape index: {}]   ;;  %s2274_s7 = inlined_call_operand.hbm [shape: f32[32,32], index: 7, kind: output, shape index: {}]  }
   0x1   :  { %v1963_v0 = vld [vmem:[%s2267_s0] sm:$0xff]  ;;  %v1968_v1 = vld [vmem:[%s2267_s0 + $0x8] sm:$0xff] }
   0x2   :  { %12 = vsyncpa [#allocation3], 0  ;;  %v34_v2 = vsel %vm33_vm0, %v1963_v0, 0.0  ;;  %v37_v3 = vsel %vm33_vm0, %v1968_v1, 0.0  ;;  %v1977_v4 = vld [vmem:[%s2267_s0 + $0x10] sm:$0xff]  ;;  %v1987_v15 = vld [vmem:[%s2267_s0 + $0x18] sm:$0xff] }
   0x3   :  { %35 = vadd.xlane.f32.xlu0 %v34_v2  ;;  %v40_v5 = vsel %vm33_vm0, %v1977_v4, 0.0  ;;  %v43_v17 = vsel %vm33_vm0, %v1987_v15, 0.0  ;;  %v97_v21 = vld [vmem:[%s2269_s2] sm:$0xff]  ;;  %v98_v22 = vld [vmem:[%s2269_s2 + $0x8] sm:$0xff]  ;;  %v99_v26 = vld [vmem:[%s2269_s2 + $0x10] sm:$0xff]  ;;  %vm204_vm1 = vcmask 130048  }
   0x4   :  { %v1686_v24 = vpack.c.bf16 %v98_v22, %v97_v21  ;;  %v100_v27 = vld [vmem:[%s2269_s2 + $0x18] sm:$0xff]  ;;  %v1436_v41 = vld [vmem:[%s2268_s1] ss:$0 sm:$0xff]  ;;  %s1911_s1 = smov 96   ;;  %s1912_s17 = smov 80   ;;  %vm2027_vm2 = vmpackc.low %vm204_vm1, %vm204_vm1 }
   0x5   :  { %v1690_v28 = vpack.c.bf16 %v100_v27, %v99_v26  ;;  %s1913_s18 = smov 112   ;;  %s1914_s19 = smov 64  }
   0x6   :  { %1687 = vmatprep.subr.bf16.mxu1 %v1686_v24  ;;  %s1915_s20 = smov 48   ;;  %s1916_s21 = smov 16  }
   0x7   :  { %38 = vadd.xlane.f32.xlu0 %v37_v3  ;;  %1689 = vmatpush3.bf16.msra.mxu1 %v1686_v24 }
   0x8   :  { %1691 = vmatprep.subr.bf16.mxu1 %v1690_v28 }
   0xb   :  { %41 = vadd.xlane.f32.xlu0 %v40_v5  ;;  %1693 = vmatpush3.bf16.msra.mxu1 %v1690_v28 }
  0x90   :  { %v36_v6 = vpop.xlane.xlu0 %35 }
  0x91   :  { %v47_v7 = vmul.f32 0.03125, %v36_v6 }
  0x93   :  { %v51_v8 = vsub.f32 %v1963_v0, %v47_v7 }
  0x94   :  { %v39_v9 = vpop.xlane.xlu0 %38 }
  0x95   :  { %v48_v10 = vmul.f32 0.03125, %v39_v9  ;;  %v55_v11 = vmul.f32 %v51_v8, %v51_v8 }
  0x97   :  { %v52_v12 = vsub.f32 %v1968_v1, %v48_v10  ;;  %v59_v13 = vsel %vm33_vm0, %v55_v11, 0.0 }
  0x98   :  { %60 = vadd.xlane.f32.xlu1 %v59_v13  ;;  %v42_v18 = vpop.xlane.xlu0 %41 }
  0x99   :  { %v56_v14 = vmul.f32 %v52_v12, %v52_v12  ;;  %v49_v19 = vmul.f32 0.03125, %v42_v18 }
  0x9b   :  { %v62_v16 = vsel %vm33_vm0, %v56_v14, 0.0  ;;  %v53_v20 = vsub.f32 %v1977_v4, %v49_v19 }
  0x9c   :  { %63 = vadd.xlane.f32.xlu1 %v62_v16 }
  0x9d   :  { %v57_v23 = vmul.f32 %v53_v20, %v53_v20 }
  0x9f   :  { %v65_v25 = vsel %vm33_vm0, %v57_v23, 0.0 }
  0xa0   :  { %44 = vadd.xlane.f32.xlu1 %v43_v17  ;;  %66 = vadd.xlane.f32.xlu0 %v65_v25 }
 0x125   :  { %v61_v29 = vpop.xlane.xlu1 %60 }
 0x126   :  { %v71_v30 = vmul.f32 0.03125, %v61_v29 }
 0x128   :  { %v75_v31 = vadd.f32 1e-05, %v71_v30 }
 0x129   :  { %v64_v32 = vpop.xlane.xlu1 %63 }
 0x12a   :  { %1831 = vrsqrt.f32 %v75_v31  ;;  %v72_v33 = vmul.f32 0.03125, %v64_v32 }
 0x12c   :  { %v76_v34 = vadd.f32 1e-05, %v72_v33 }
 0x12d   :  { %v45_v35 = vpop.xlane.xlu1 %44  ;;  %v67_v47 = vpop.xlane.xlu0 %66 }
 0x12e   :  { %1833 = vrsqrt.f32 %v76_v34  ;;  %v50_v36 = vmul.f32 0.03125, %v45_v35  ;;  %v73_v48 = vmul.f32 0.03125, %v67_v47 }
 0x130   :  { %v54_v37 = vsub.f32 %v1987_v15, %v50_v36  ;;  %v77_v49 = vadd.f32 1e-05, %v73_v48 }
 0x132   :  { %v58_v38 = vmul.f32 %v54_v37, %v54_v37  ;;  %1835 = vrsqrt.f32 %v77_v49 }
 0x134   :  { %v1832_v39 = vpop.eup %1831  ;;  %v68_v40 = vsel %vm33_vm0, %v58_v38, 0.0 }
 0x135   :  { %69 = vadd.xlane.f32.xlu1 %v68_v40  ;;  %v83_v42 = vmul.f32 %v1832_v39, %v51_v8 }
 0x137   :  { %v93_v43 = vmul.f32 %v1436_v41, %v83_v42 }
 0x138   :  { %v1834_v44 = vpop.eup %1833 }
 0x139   :  { %1558 = vmatprep.mubr.msk.f32.mxu1 %vm33_vm0, %v93_v43  ;;  %v84_v45 = vmul.f32 %v1834_v44, %v52_v12 }
 0x13b   :  { %v94_v46 = vmul.f32 %v1436_v41, %v84_v45 }
 0x13c   :  { %v1836_v50 = vpop.eup %1835 }
 0x13d   :  { %1559 = vmatmul.mubr.msk.f32.vlgmr.msra.gmra.mrb[0].mxu1 %vm33_vm0, %v94_v46  ;;  %v85_v51 = vmul.f32 %v1836_v50, %v53_v20 }
 0x13f   :  { %v95_v52 = vmul.f32 %v1436_v41, %v85_v51 }
 0x141   :  { %1561 = vmatprep.mubr.msk.f32.mxu1 %vm33_vm0, %v95_v52 }
 0x1c2   :  { %v70_v53 = vpop.xlane.xlu1 %69 }
 0x1c3   :  { %v74_v54 = vmul.f32 0.03125, %v70_v53 }
 0x1c5   :  { %v78_v55 = vadd.f32 1e-05, %v74_v54 }
 0x1c7   :  { %1837 = vrsqrt.f32 %v78_v55 }
 0x1d1   :  { %v1838_v56 = vpop.eup %1837 }
 0x1d2   :  { %v86_v57 = vmul.f32 %v1838_v56, %v54_v37 }
 0x1d4   :  { %v96_v58 = vmul.f32 %v1436_v41, %v86_v57 }
 0x1d6   :  { %1562 = vmatmul.mubr.msk.f32.gmra.mrb[2].mxu1 %vm33_vm0, %v96_v58 }
 0x210   :  { %v2015_v59 = vpop.f32.mrb[0].mxu1 }
 0x211   :  { %v179_v60 = vpop.f32.mrb[1].mxu1 }
 0x212   :  { %1568 = vmatprep.mubr.msk.f32.mxu1 %vm204_vm1, %v179_v60  ;;  %v2019_v61 = vpack.i.bf16 %v2015_v59, %v179_v60 }
 0x214   :  { %1792 = vrot.lane.b32.xlu0 %v2019_v61, %s1911_s1 }
 0x218   :  { %1802 = vrot.lane.b32.xlu0 %v2019_v61, %s1912_s17 }
 0x21c   :  { %399 = vrot.lane.b32.xlu0 %v179_v60, %s1913_s18 }
 0x286   :  { %v1793_v62 = vpop.permute.xlu0 %1792 }
 0x287   :  { %v1795_v63 = vunpack.i.h.bf16 %v1793_v62  ;;  %v1794_v2 = vunpack.i.l.bf16 %v1793_v62 }
 0x289   :  { %v1694_v5 = vpack.c.bf16 %v1795_v63, %v1794_v2 }
 0x28a   :  { %v1803_v9 = vpop.permute.xlu0 %1802 }
 0x28b   :  { %1696 = vmatprep.subr.msk.bf16.mxu1 %vm2027_vm2, %v1694_v5  ;;  %v1805_v29 = vunpack.i.h.bf16 %v1803_v9  ;;  %v1804_v32 = vunpack.i.l.bf16 %v1803_v9 }
 0x28c   :  { %1699 = vmatpush3.bf16.xpose.msk.msra.mxu1 %vm2027_vm2, %v1694_v5 }
 0x28d   :  { %v1704_v36 = vpack.c.bf16 %v1805_v29, %v1804_v32 }
 0x28e   :  { %v400_v10 = vpop.permute.xlu0 %399 }
 0x293   :  { %1569 = vmatmul.mubr.msk.f32.vlgmr.msra.gmra.mrb[4].mxu1 %vm204_vm1, %v2015_v59 }
 0x2a9   :  { %v2037_v6 = vpop.f32.mrb[2].mxu1 }
 0x2aa   :  { %v2039_v7 = vpop.f32.mrb[3].mxu1 }
 0x2ab   :  { %v2043_v8 = vpack.i.bf16 %v2037_v6, %v2039_v7  ;;  %1596 = vmatprep.mubr.msk.f32.mxu0 %vm204_vm1, %v2039_v7 }
 0x2ad   :  { %1807 = vrot.lane.b32.xlu0 %v2043_v8, %s1911_s1 }
 0x31f   :  { %v1808_v11 = vpop.permute.xlu0 %1807 }
 0x320   :  { %v1810_v12 = vunpack.i.h.bf16 %v1808_v11  ;;  %v1809_v13 = vunpack.i.l.bf16 %v1808_v11 }
 0x322   :  { %v1714_v14 = vpack.c.bf16 %v1810_v12, %v1809_v13 }
 0x324   :  { %1716 = vmatprep.subr.msk.bf16.mxu0 %vm2027_vm2, %v1714_v14 }
 0x325   :  { %1719 = vmatpush3.bf16.xpose.msk.msra.mxu0 %vm2027_vm2, %v1714_v14 }
 0x32c   :  { %1597 = vmatmul.mubr.msk.f32.vlgmr.msra.gmra.mrb[0].mxu0 %vm204_vm1, %v2037_v6 }
 0x366   :  { %v1570_v16 = vpop.f32.mrb[4].mxu1 }
 0x367   :  { %v279_v17 = vpop.f32.mrb[5].mxu1  ;;  %v289_v19 = vmul.f32 0.25, %v1570_v16 }
 0x368   :  { %v288_v18 = vmul.f32 0.25, %v279_v17 }
 0x369   :  { %v293_v21 = vsel %vm204_vm1, %v289_v19, -inf }
 0x36a   :  { %v290_v20 = vsel %vm204_vm1, %v288_v18, -inf }
 0x36b   :  { %291 = vmax.xlane.f32.xlu1 %v290_v20 }
 0x36f   :  { %294 = vmax.xlane.f32.xlu1 %v293_v21 }
 0x380   :  { %1797 = vrot.lane.b32.xlu1 %v2019_v61, %s1914_s19 }
 0x3f8   :  { %v292_v22 = vpop.xlane.xlu1 %291 }
 0x3f9   :  { %v296_v23 = vsub.f32 %v288_v18, %v292_v22 }
 0x3fb   :  { %v298_v26 = vmul.f32 1.442695, %v296_v23 }
 0x3fc   :  { %v295_v24 = vpop.xlane.xlu1 %294 }
 0x3fd   :  { %v297_v25 = vsub.f32 %v289_v19, %v295_v24 }
 0x3ff   :  { %v300_v27 = vmul.f32 1.442695, %v297_v25  ;;  %v1598_v28 = vpop.f32.mrb[0].mxu0 }
 0x400   :  { %v691_v30 = vpop.f32.mrb[1].mxu0  ;;  %v1798_v31 = vpop.permute.xlu1 %1797  ;;  %v701_v57 = vmul.f32 0.25, %v1598_v28 }
 0x401   :  { %1839 = vpow2.f32 %v300_v27  ;;  %v1800_v33 = vunpack.i.h.bf16 %v1798_v31  ;;  %v1799_v34 = vunpack.i.l.bf16 %v1798_v31  ;;  %v700_v55 = vmul.f32 0.25, %v691_v30 }
 0x402   :  { %1841 = vpow2.f32 %v298_v26 }
 0x403   :  { %v1700_v35 = vpack.c.bf16 %v1800_v33, %v1799_v34  ;;  %v702_v58 = vsel %vm204_vm1, %v700_v55, -inf }
 0x405   :  { %1701 = vmatprep.subr.bf16.mxu1 %v1700_v35 }
 0x406   :  { %1703 = vmatpush3.bf16.msra.mxu1 %v1700_v35 }
 0x407   :  { %1706 = vmatprep.subr.msk.bf16.mxu1 %vm2027_vm2, %v1704_v36 }
 0x40b   :  { %v1840_v37 = vpop.eup %1839 }
 0x40c   :  { %v305_v38 = vsel %vm204_vm1, %v1840_v37, 0.0  ;;  %v1842_v39 = vpop.eup %1841 }
 0x40d   :  { %306 = vadd.xlane.f32.xlu1 %v305_v38  ;;  %v302_v40 = vsel %vm204_vm1, %v1842_v39, 0.0 }
 0x411   :  { %303 = vadd.xlane.f32.xlu1 %v302_v40 }
 0x422   :  { %401 = vrot.lane.b32.xlu1 %v2015_v59, %s1913_s18  ;;  %v705_v59 = vsel %vm204_vm1, %v701_v57, -inf }
 0x49a   :  { %v307_v41 = vpop.xlane.xlu1 %306 }
 0x49b   :  { %1843 = vrcp.f32 %v307_v41 }
 0x49e   :  { %v304_v42 = vpop.xlane.xlu1 %303 }
 0x49f   :  { %1845 = vrcp.f32 %v304_v42 }
 0x4a2   :  { %v402_v47 = vpop.permute.xlu1 %401 }
 0x4a5   :  { %v1844_v43 = vpop.eup %1843 }
 0x4a6   :  { %v311_v46 = vmul.f32 %v1844_v43, %v1840_v37 }
 0x4a9   :  { %v1846_v44 = vpop.eup %1845 }
 0x4aa   :  { %v310_v45 = vmul.f32 %v1846_v44, %v1842_v39 }
 0x4ac   :  { %1575 = vmatprep.mubr.msk.f32.mxu1 %vm204_vm1, %v310_v45 }
 0x4ad   :  { %1576 = vmatmul.mubr.msk.f32.vlgmr.msra.gmra.mrb[6].mxu1 %vm204_vm1, %v311_v46 }
 0x4ae   :  { %1709 = vmatpush3.bf16.xpose.msk.msra.mxu1 %vm2027_vm2, %v1704_v36  ;;  %1582 = vmatprep.mubr.msk.f32.mxu1 %vm204_vm1, %v400_v10 }
 0x4b5   :  { %1583 = vmatmul.mubr.msk.f32.vlgmr.msra.gmra.mrb[8].mxu1 %vm204_vm1, %v402_v47 }
 0x580   :  { %v2070_v48 = vpop.f32.mrb[6].mxu1 }
 0x581   :  { %v2072_v49 = vpop.f32.mrb[7].mxu1 }
 0x588   :  { %v1584_v50 = vpop.f32.mrb[8].mxu1 }
 0x589   :  { %v491_v51 = vmul.f32 0.25, %v1584_v50  ;;  %v481_v52 = vpop.f32.mrb[9].mxu1 }
 0x58a   :  { %v490_v53 = vmul.f32 0.25, %v481_v52 }
 0x58b   :  { %v495_v54 = vsel %vm204_vm1, %v491_v51, -inf }
 0x58c   :  { %496 = vmax.xlane.f32.xlu1 %v495_v54  ;;  %v492_v56 = vsel %vm204_vm1, %v490_v53, -inf }
 0x58d   :  { %493 = vmax.xlane.f32.xlu0 %v492_v56 }
 0x591   :  { %703 = vmax.xlane.f32.xlu0 %v702_v58 }
 0x595   :  { %706 = vmax.xlane.f32.xlu0 %v705_v59 }
 0x619   :  { %v497_v63 = vpop.xlane.xlu1 %496 }
 0x61a   :  { %v494_v60 = vpop.xlane.xlu0 %493  ;;  %v499_v9 = vsub.f32 %v491_v51, %v497_v63 }
 0x61b   :  { %v498_v62 = vsub.f32 %v490_v53, %v494_v60 }
 0x61c   :  { %v502_v14 = vmul.f32 1.442695, %v499_v9 }
 0x61d   :  { %v500_v10 = vmul.f32 1.442695, %v498_v62 }
 0x61e   :  { %v704_v2 = vpop.xlane.xlu0 %703 }
 0x61f   :  { %v708_v5 = vsub.f32 %v700_v55, %v704_v2 }
 0x621   :  { %v710_v11 = vmul.f32 1.442695, %v708_v5 }
 0x622   :  { %v707_v12 = vpop.xlane.xlu0 %706 }
 0x623   :  { %1847 = vpow2.f32 %v710_v11  ;;  %v709_v13 = vsub.f32 %v701_v57, %v707_v12 }
 0x624   :  { %1849 = vpow2.f32 %v500_v10 }
 0x625   :  { %v712_v16 = vmul.f32 1.442695, %v709_v13 }
 0x627   :  { %1851 = vpow2.f32 %v712_v16 }
 0x628   :  { %1853 = vpow2.f32 %v502_v14 }
 0x62d   :  { %v1848_v17 = vpop.eup %1847 }
 0x62e   :  { %v714_v18 = vsel %vm204_vm1, %v1848_v17, 0.0  ;;  %v1850_v19 = vpop.eup %1849 }
 0x62f   :  { %715 = vadd.xlane.f32.xlu0 %v714_v18  ;;  %v504_v21 = vsel %vm204_vm1, %v1850_v19, 0.0  ;;  %v1024_v18 = vld [vmem:[%s2270_s3 + $0x8] sm:$0xff] }
 0x631   :  { %v1852_v20 = vpop.eup %1851 }
 0x632   :  { %v717_v22 = vsel %vm204_vm1, %v1852_v20, 0.0  ;;  %v1854_v23 = vpop.eup %1853 }
 0x633   :  { %505 = vadd.xlane.f32.xlu0 %v504_v21  ;;  %718 = vadd.xlane.f32.xlu1 %v717_v22  ;;  %v507_v24 = vsel %vm204_vm1, %v1854_v23, 0.0 }
 0x637   :  { %508 = vadd.xlane.f32.xlu1 %v507_v24  ;;  %v1025_v24 = vld [vmem:[%s2270_s3 + $0x10] sm:$0xff] }
 0x648   :  { %1817 = vrot.lane.b32.xlu1 %v2043_v8, %s1914_s19 }
 0x649   :  { %1812 = vrot.lane.b32.xlu0 %v2019_v61, %s1915_s20 }
 0x64c   :  { %1822 = vrot.lane.b32.xlu1 %v2043_v8, %s1912_s17 }
 0x64d   :  { %813 = vrot.lane.b32.xlu0 %v2037_v6, %s1913_s18 }
 0x650   :  { %811 = vrot.lane.b32.xlu1 %v2039_v7, %s1913_s18 }
 0x6bc   :  { %v716_v25 = vpop.xlane.xlu0 %715 }
 0x6c0   :  { %v719_v26 = vpop.xlane.xlu1 %718  ;;  %v506_v27 = vpop.xlane.xlu0 %505 }
 0x6c1   :  { %1855 = vrcp.f32 %v506_v27 }
 0x6c2   :  { %1857 = vrcp.f32 %v716_v25  ;;  %v1026_v25 = vld [vmem:[%s2270_s3 + $0x18] sm:$0xff] }
 0x6c4   :  { %v509_v28 = vpop.xlane.xlu1 %508  ;;  %v1813_v29 = vpop.permute.xlu0 %1812 }
 0x6c5   :  { %1859 = vrcp.f32 %v509_v28  ;;  %v1815_v30 = vunpack.i.h.bf16 %v1813_v29  ;;  %v1814_v31 = vunpack.i.l.bf16 %v1813_v29  ;;  %v1738_v29 = vpack.c.bf16 %v1026_v25, %v1025_v24 }
 0x6c6   :  { %1861 = vrcp.f32 %v719_v26 }
 0x6c7   :  { %v1710_v61 = vpack.c.bf16 %v1815_v30, %v1814_v31 }
 0x6c8   :  { %v1818_v32 = vpop.permute.xlu1 %1817  ;;  %v814_v47 = vpop.permute.xlu0 %813 }
 0x6c9   :  { %v1820_v33 = vunpack.i.h.bf16 %v1818_v32  ;;  %v1819_v34 = vunpack.i.l.bf16 %v1818_v32  ;;  %1711 = vmatprep.subr.bf16.mxu1 %v1710_v61 }
 0x6ca   :  { %1713 = vmatpush3.bf16.msra.mxu1 %v1710_v61 }
 0x6cb   :  { %v1720_v6 = vpack.c.bf16 %v1820_v33, %v1819_v34  ;;  %v1856_v35 = vpop.eup %1855 }
 0x6cc   :  { %v1823_v7 = vpop.permute.xlu1 %1822  ;;  %v512_v36 = vmul.f32 %v1856_v35, %v1850_v19  ;;  %v1858_v37 = vpop.eup %1857 }
 0x6cd   :  { %1721 = vmatprep.subr.bf16.mxu1 %v1720_v6  ;;  %v1825_v38 = vunpack.i.h.bf16 %v1823_v7  ;;  %v1824_v39 = vunpack.i.l.bf16 %v1823_v7  ;;  %v722_v43 = vmul.f32 %v1858_v37, %v1848_v17  ;;  %v1023_v17 = vld [vmem:[%s2270_s3] sm:$0xff] }
 0x6ce   :  { %1589 = vmatprep.mubr.msk.f32.mxu1 %vm204_vm1, %v512_v36  ;;  %v1734_v19 = vpack.c.bf16 %v1024_v18, %v1023_v17 }
 0x6cf   :  { %v1860_v40 = vpop.eup %1859  ;;  %v1724_v44 = vpack.c.bf16 %v1825_v38, %v1824_v39 }
 0x6d0   :  { %v513_v41 = vmul.f32 %v1860_v40, %v1854_v23  ;;  %v1862_v42 = vpop.eup %1861  ;;  %v812_v46 = vpop.permute.xlu1 %811 }
 0x6d1   :  { %v723_v45 = vmul.f32 %v1862_v42, %v1852_v20 }
 0x6d2   :  { %1590 = vmatmul.mubr.msk.f32.vlgmr.msra.gmra.mrb[10].mxu1 %vm204_vm1, %v513_v41 }
 0x6d3   :  { %1723 = vmatpush3.bf16.msra.mxu1 %v1720_v6  ;;  %1603 = vmatprep.mubr.msk.f32.mxu1 %vm204_vm1, %v722_v43 }
 0x6d4   :  { %1726 = vmatprep.subr.msk.bf16.mxu1 %vm2027_vm2, %v1724_v44 }
 0x6d6   :  { %1604 = vmatmul.mubr.msk.f32.vlgmr.msra.gmra.mrb[12].mxu1 %vm204_vm1, %v723_v45 }
 0x6d7   :  { %1610 = vmatprep.mubr.msk.f32.mxu1 %vm204_vm1, %v812_v46 }
 0x6dc   :  { %1729 = vmatpush3.bf16.xpose.msk.msra.mxu1 %vm2027_vm2, %v1724_v44 }
 0x6e3   :  { %1611 = vmatmul.mubr.msk.f32.vlgmr.msra.gmra.mrb[14].mxu1 %vm204_vm1, %v814_v47 }
 0x7a5   :  { %v1591_v50 = vpop.f32.mrb[10].mxu1 }
 0x7a6   :  { %v592_v51 = vpop.f32.mrb[11].mxu1 }
 0x7a9   :  { %v2102_v52 = vpop.f32.mrb[12].mxu1 }
 0x7aa   :  { %v2104_v53 = vpop.f32.mrb[13].mxu1 }
 0x7b6   :  { %v1612_v54 = vpop.f32.mrb[14].mxu1 }
 0x7b7   :  { %v903_v55 = vmul.f32 0.25, %v1612_v54  ;;  %v893_v56 = vpop.f32.mrb[15].mxu1 }
 0x7b8   :  { %v902_v57 = vmul.f32 0.25, %v893_v56  ;;  %v1192_v56 = vld [vmem:[%s2272_s5 + $0x10] sm:$0xff] }
 0x7b9   :  { %v907_v58 = vsel %vm204_vm1, %v903_v55, -inf }
 0x7ba   :  { %908 = vmax.xlane.f32.xlu0 %v907_v58  ;;  %v904_v59 = vsel %vm204_vm1, %v902_v57, -inf  ;;  %v1193_v58 = vld [vmem:[%s2272_s5 + $0x18] sm:$0xff] }
 0x7bb   :  { %905 = vmax.xlane.f32.xlu1 %v904_v59  ;;  %v1746_v59 = vpack.c.bf16 %v1193_v58, %v1192_v56 }
 0x7cc   :  { %1827 = vrot.lane.b32.xlu1 %v2043_v8, %s1915_s20 }
 0x7d0   :  { %605 = vrot.lane.b32.xlu1 %v1591_v50, %s1916_s21 }
 0x847   :  { %v909_v3 = vpop.xlane.xlu0 %908 }
 0x848   :  { %v911_v60 = vsub.f32 %v903_v55, %v909_v3  ;;  %v906_v62 = vpop.xlane.xlu1 %905 }
 0x849   :  { %v910_v63 = vsub.f32 %v902_v57, %v906_v62 }
 0x84a   :  { %v914_v2 = vmul.f32 1.442695, %v911_v60 }
 0x84b   :  { %v912_v5 = vmul.f32 1.442695, %v910_v63 }
 0x84c   :  { %v1828_v9 = vpop.permute.xlu1 %1827 }
 0x84d   :  { %1863 = vpow2.f32 %v912_v5  ;;  %v1830_v10 = vunpack.i.h.bf16 %v1828_v9  ;;  %v1829_v11 = vunpack.i.l.bf16 %v1828_v9 }
 0x84e   :  { %1865 = vpow2.f32 %v914_v2 }
 0x84f   :  { %v1730_v12 = vpack.c.bf16 %v1830_v10, %v1829_v11 }
 0x850   :  { %v606_v31 = vpop.permute.xlu1 %605 }
 0x851   :  { %1731 = vmatprep.subr.bf16.mxu0 %v1730_v12  ;;  %v610_v61 = vsel %vm204_vm1, %v2070_v48, %v606_v31 }
 0x852   :  { %1733 = vmatpush3.bf16.msra.mxu0 %v1730_v12 }
 0x853   :  { %1735 = vmatprep.subr.bf16.mxu0 %v1734_v19 }
 0x857   :  { %v1864_v13 = vpop.eup %1863 }
 0x858   :  { %v916_v8 = vsel %vm204_vm1, %v1864_v13, 0.0  ;;  %v1866_v14 = vpop.eup %1865 }
 0x859   :  { %917 = vadd.xlane.f32.xlu0 %v916_v8  ;;  %v919_v16 = vsel %vm204_vm1, %v1866_v14, 0.0 }
 0x85d   :  { %920 = vadd.xlane.f32.xlu0 %v919_v16 }
 0x873   :  { %603 = vrot.lane.b32.xlu0 %v592_v51, %s1916_s21 }
 0x8e6   :  { %v918_v20 = vpop.xlane.xlu0 %917 }
 0x8e7   :  { %1867 = vrcp.f32 %v918_v20 }
 0x8ea   :  { %v921_v21 = vpop.xlane.xlu0 %920 }
 0x8eb   :  { %1869 = vrcp.f32 %v921_v21 }
 0x8ee   :  { %v604_v27 = vpop.permute.xlu0 %603 }
 0x8ef   :  { %v609_v30 = vsel %vm204_vm1, %v2072_v49, %v604_v27  ;;  %v1312_v27 = vld [vmem:[%s2273_s6 + $0x8] sm:$0xff] }
 0x8f1   :  { %v1868_v22 = vpop.eup %1867 }
 0x8f2   :  { %v924_v23 = vmul.f32 %v1868_v22, %v1864_v13  ;;  %v1469_v22 = vld [vmem:[%s2271_s4] ss:$0 sm:$0xff] }
 0x8f4   :  { %1617 = vmatprep.mubr.msk.f32.mxu0 %vm204_vm1, %v924_v23 }
 0x8f5   :  { %v1870_v26 = vpop.eup %1869 }
 0x8f6   :  { %v925_v28 = vmul.f32 %v1870_v26, %v1866_v14  ;;  %v1311_v26 = vld [vmem:[%s2273_s6] sm:$0xff] }
 0x8f8   :  { %1618 = vmatmul.mubr.msk.f32.vlgmr.msra.gmra.mrb[2].mxu0 %vm204_vm1, %v925_v28  ;;  %v1313_v28 = vld [vmem:[%s2273_s6 + $0x10] sm:$0xff] }
 0x8f9   :  { %1737 = vmatpush3.bf16.msra.mxu0 %v1734_v19  ;;  %1628 = vmatprep.mubr.msk.f32.mxu0 %vm33_vm0, %v609_v30  ;;  %v1314_v30 = vld [vmem:[%s2273_s6 + $0x18] sm:$0xff] }
 0x8fa   :  { %1739 = vmatprep.subr.bf16.mxu0 %v1738_v29  ;;  %v1754_v31 = vpack.c.bf16 %v1314_v30, %v1313_v28 }
 0x8fd   :  { %1741 = vmatpush3.bf16.msra.mxu0 %v1738_v29  ;;  %v1750_v29 = vpack.c.bf16 %v1312_v27, %v1311_v26 }
 0x8ff   :  { %1751 = vmatprep.subr.bf16.mxu0 %v1750_v29 }
 0x900   :  { %1629 = vmatmul.mubr.msk.f32.vlgmr.msra.gmra.mrb[4].mxu0 %vm33_vm0, %v610_v61  ;;  %v1315_v61 = vld [vmem:[%s2273_s6 + $0x20] sm:$0xff] }
 0x901   :  { %1753 = vmatpush3.bf16.msra.mxu0 %v1750_v29 }
 0x902   :  { %1755 = vmatprep.subr.bf16.mxu0 %v1754_v31 }
 0x905   :  { %1757 = vmatpush3.bf16.msra.mxu0 %v1754_v31 }
 0x9cb   :  { %v1619_v32 = vpop.f32.mrb[2].mxu0 }
 0x9cc   :  { %v1004_v33 = vpop.f32.mrb[3].mxu0 }
 0x9cd   :  { %1015 = vrot.lane.b32.xlu1 %v1004_v33, %s1916_s21 }
 0x9d1   :  { %1017 = vrot.lane.b32.xlu1 %v1619_v32, %s1916_s21  ;;  %v1316_v32 = vld [vmem:[%s2273_s6 + $0x28] sm:$0xff] }
 0x9d2   :  { %v1758_v33 = vpack.c.bf16 %v1316_v32, %v1315_v61 }
 0x9d3   :  { %v1630_v49 = vpop.f32.mrb[4].mxu0 }
 0x9d4   :  { %v1105_v34 = vpop.f32.mrb[5].mxu0  ;;  %v2142_v7 = vadd.f32 %v1630_v49, %v1968_v1  ;;  %1759 = vmatprep.subr.bf16.mxu0 %v1758_v33  ;;  %v1317_v49 = vld [vmem:[%s2273_s6 + $0x30] sm:$0xff] }
 0x9d5   :  { %v2137_v6 = vadd.f32 %v1105_v34, %v1963_v0  ;;  %1761 = vmatpush3.bf16.msra.mxu0 %v1758_v33  ;;  %v1318_v34 = vld [vmem:[%s2273_s6 + $0x38] sm:$0xff] }
 0x9d6   :  { %v1131_v48 = vsel %vm33_vm0, %v2142_v7, 0.0 }
 0x9d7   :  { %v1128_v35 = vsel %vm33_vm0, %v2137_v6, 0.0 }
 0x9d8   :  { %1129 = vadd.xlane.f32.xlu0 %v1128_v35  ;;  %v1762_v35 = vpack.c.bf16 %v1318_v34, %v1317_v49 }
 0x9da   :  { %1763 = vmatprep.subr.bf16.mxu0 %v1762_v35 }
 0x9db   :  { %1765 = vmatpush3.bf16.msra.mxu0 %v1762_v35 }
 0x9f5   :  { %1132 = vadd.xlane.f32.xlu1 %v1131_v48  ;;  %v1319_v48 = vld [vmem:[%s2273_s6 + $0x40] sm:$0xff] }
 0xa3f   :  { %v1016_v36 = vpop.permute.xlu1 %1015 }
 0xa40   :  { %v1021_v37 = vsel %vm204_vm1, %v2104_v53, %v1016_v36  ;;  %v1320_v36 = vld [vmem:[%s2273_s6 + $0x48] sm:$0xff] }
 0xa41   :  { %1631 = vmatprep.mubr.msk.f32.mxu0 %vm33_vm0, %v1021_v37  ;;  %v1766_v37 = vpack.c.bf16 %v1320_v36, %v1319_v48 }
 0xa43   :  { %v1018_v38 = vpop.permute.xlu1 %1017  ;;  %1767 = vmatprep.subr.bf16.mxu0 %v1766_v37 }
 0xa44   :  { %v1022_v0 = vsel %vm204_vm1, %v2102_v52, %v1018_v38  ;;  %1769 = vmatpush3.bf16.msra.mxu0 %v1766_v37  ;;  %v1321_v38 = vld [vmem:[%s2273_s6 + $0x50] sm:$0xff] }
 0xa45   :  { %1632 = vmatmul.mubr.msk.f32.gmra.mrb[6].mxu0 %vm33_vm0, %v1022_v0  ;;  %v1322_v0 = vld [vmem:[%s2273_s6 + $0x58] sm:$0xff] }
 0xa65   :  { %v1130_v43 = vpop.xlane.xlu0 %1129 }
 0xa66   :  { %v1140_v44 = vmul.f32 0.03125, %v1130_v43  ;;  %v1326_v43 = vld [vmem:[%s2273_s6 + $0x78] sm:$0xff] }
 0xa68   :  { %v1144_v50 = vsub.f32 %v2137_v6, %v1140_v44 }
 0xa6a   :  { %v1148_v54 = vmul.f32 %v1144_v50, %v1144_v50 }
 0xa6c   :  { %v1152_v55 = vsel %vm33_vm0, %v1148_v54, 0.0 }
 0xa82   :  { %v1133_v39 = vpop.xlane.xlu1 %1132 }
 0xa83   :  { %v1141_v40 = vmul.f32 0.03125, %v1133_v39  ;;  %v1770_v39 = vpack.c.bf16 %v1322_v0, %v1321_v38 }
 0xa85   :  { %v1145_v1 = vsub.f32 %v2142_v7, %v1141_v40  ;;  %1771 = vmatprep.subr.bf16.mxu0 %v1770_v39  ;;  %v1323_v40 = vld [vmem:[%s2273_s6 + $0x60] sm:$0xff] }
 0xa86   :  { %1773 = vmatpush3.bf16.msra.mxu0 %v1770_v39 }
 0xa87   :  { %v1149_v41 = vmul.f32 %v1145_v1, %v1145_v1 }
 0xa89   :  { %v1155_v42 = vsel %vm33_vm0, %v1149_v41, 0.0 }
 0xa8a   :  { %1156 = vadd.xlane.f32.xlu1 %v1155_v42  ;;  %v1325_v42 = vld [vmem:[%s2273_s6 + $0x70] sm:$0xff] }
 0xa8b   :  { %v1778_v44 = vpack.c.bf16 %v1326_v43, %v1325_v42 }
 0xb17   :  { %v1157_v3 = vpop.xlane.xlu1 %1156 }
 0xb18   :  { %v1633_v45 = vpop.f32.mrb[6].mxu0  ;;  %v1165_v63 = vmul.f32 0.03125, %v1157_v3 }
 0xb19   :  { %v1115_v46 = vpop.f32.mrb[7].mxu0  ;;  %v2159_v51 = vadd.f32 %v1633_v45, %v1987_v15  ;;  %v1191_v15 = vld [vmem:[%s2272_s5 + $0x8] sm:$0xff] }
 0xb1a   :  { %v2155_v47 = vadd.f32 %v1115_v46, %v1977_v4  ;;  %v1190_v4 = vld [vmem:[%s2272_s5] sm:$0xff]  ;;  %v1169_v11 = vadd.f32 1e-05, %v1165_v63 }
 0xb1b   :  { %v1137_v53 = vsel %vm33_vm0, %v2159_v51, 0.0  ;;  %v1742_v57 = vpack.c.bf16 %v1191_v15, %v1190_v4 }
 0xb1c   :  { %v1134_v52 = vsel %vm33_vm0, %v2155_v47, 0.0  ;;  %1871 = vrsqrt.f32 %v1169_v11 }
 0xb1d   :  { %1135 = vadd.xlane.f32.xlu0 %v1134_v52  ;;  %1743 = vmatprep.subr.bf16.mxu1 %v1742_v57 }
 0xb1e   :  { %1745 = vmatpush3.bf16.msra.mxu1 %v1742_v57 }
 0xb1f   :  { %1747 = vmatprep.subr.bf16.mxu1 %v1746_v59 }
 0xb21   :  { %1138 = vadd.xlane.f32.xlu0 %v1137_v53 }
 0xb22   :  { %1749 = vmatpush3.bf16.msra.mxu1 %v1746_v59 }
 0xb25   :  { %1153 = vadd.xlane.f32.xlu0 %v1152_v55 }
 0xb26   :  { %v1872_v19 = vpop.eup %1871 }
 0xb27   :  { %v1177_v21 = vmul.f32 %v1872_v19, %v1145_v1  ;;  %v1324_v1 = vld [vmem:[%s2273_s6 + $0x68] sm:$0xff]  ;;  %s1917_s6 = smov [#allocation2]  }
 0xb28   :  { %v1774_v41 = vpack.c.bf16 %v1324_v1, %v1323_v40  ;;  %s1425_s16 = sshll.u32 %s1917_s6, 4  ;;  %s1426_s16 = int_to_ptr.vmem [resolvable:$true] %s1425_s16 }
 0xb29   :  { %v1187_v25 = vmul.f32 %v1469_v22, %v1177_v21  ;;  %s1887_s1 = scalar_lea.vmem %s1426_s16, 512  ;;  %p1892_p1 = scmp.lt.s32.totalorder %s1426_s16, %s1426_s16 }
 0xb2a   :  { %1775 = vmatprep.subr.bf16.mxu0 %v1774_v41  ;;  %p1888_p0 = scmp.ne.s32.totalorder %s1426_s16, %s1887_s1  ;;  %p1893_p2 = scmp.lt.s32.totalorder %s1887_s1, %s1887_s1 }
 0xb2b   :  { %1777 = vmatpush3.bf16.msra.mxu0 %v1774_v41 }
 0xb2c   :  { %1779 = vmatprep.subr.bf16.mxu0 %v1778_v44  ;;  %p1894_p3 = por %p1893_p2, %p1892_p1 }
 0xb2e   :  { %p1895_p4 = pnand %p1894_p3, %p1888_p0 }
 0xb2f   :  { %1781 = vmatpush3.bf16.msra.mxu0 %v1778_v44 }
 0xbaa   :  { %v1136_v60 = vpop.xlane.xlu0 %1135 }
 0xbab   :  { %v1142_v62 = vmul.f32 0.03125, %v1136_v60 }
 0xbad   :  { %v2179_v2 = vsub.f32 %v2155_v47, %v1142_v62 }
 0xbae   :  { %v1139_v5 = vpop.xlane.xlu0 %1138 }
 0xbaf   :  { %v1143_v9 = vmul.f32 0.03125, %v1139_v5  ;;  %v1150_v10 = vmul.f32 %v2179_v2, %v2179_v2 }
 0xbb1   :  { %v2184_v12 = vsub.f32 %v2159_v51, %v1143_v9  ;;  %v1158_v13 = vsel %vm33_vm0, %v1150_v10, 0.0 }
 0xbb2   :  { %1159 = vadd.xlane.f32.xlu0 %v1158_v13  ;;  %v1154_v8 = vpop.xlane.xlu0 %1153 }
 0xbb3   :  { %v1164_v14 = vmul.f32 0.03125, %v1154_v8  ;;  %v1151_v16 = vmul.f32 %v2184_v12, %v2184_v12 }
 0xbb5   :  { %v1168_v17 = vadd.f32 1e-05, %v1164_v14  ;;  %v1161_v18 = vsel %vm33_vm0, %v1151_v16, 0.0 }
 0xbb6   :  { %1162 = vadd.xlane.f32.xlu1 %v1161_v18 }
 0xbb7   :  { %1873 = vrsqrt.f32 %v1168_v17 }
 0xbc1   :  { %v1874_v20 = vpop.eup %1873 }
 0xbc2   :  { %v1176_v23 = vmul.f32 %v1874_v20, %v1144_v50 }
 0xbc4   :  { %v1186_v24 = vmul.f32 %v1469_v22, %v1176_v23 }
 0xbc6   :  { %1642 = vmatprep.mubr.msk.f32.mxu1 %vm33_vm0, %v1186_v24 }
 0xbc7   :  { %1643 = vmatmul.mubr.msk.f32.vlgmr.msra.gmra.mrb[16].mxu1 %vm33_vm0, %v1187_v25 }
 0xc3f   :  { %v1160_v45 = vpop.xlane.xlu0 %1159 }
 0xc40   :  { %v1166_v46 = vmul.f32 0.03125, %v1160_v45 }
 0xc42   :  { %v1170_v50 = vadd.f32 1e-05, %v1166_v46 }
 0xc43   :  { %v1163_v52 = vpop.xlane.xlu1 %1162 }
 0xc44   :  { %1875 = vrsqrt.f32 %v1170_v50  ;;  %v1167_v53 = vmul.f32 0.03125, %v1163_v52 }
 0xc46   :  { %v1171_v54 = vadd.f32 1e-05, %v1167_v53 }
 0xc48   :  { %1877 = vrsqrt.f32 %v1171_v54 }
 0xc4e   :  { %v1876_v55 = vpop.eup %1875 }
 0xc4f   :  { %v1178_v4 = vmul.f32 %v1876_v55, %v2179_v2 }
 0xc51   :  { %v1188_v15 = vmul.f32 %v1469_v22, %v1178_v4 }
 0xc52   :  { %v1878_v56 = vpop.eup %1877 }
 0xc53   :  { %1645 = vmatprep.mubr.msk.f32.mxu1 %vm33_vm0, %v1188_v15  ;;  %v1179_v57 = vmul.f32 %v1878_v56, %v2184_v12 }
 0xc55   :  { %v1189_v58 = vmul.f32 %v1469_v22, %v1179_v57 }
 0xc57   :  { %1646 = vmatmul.mubr.msk.f32.gmra.mrb[18].mxu1 %vm33_vm0, %v1189_v58 }
 0xc9a   :  { %v1644_v59 = vpop.f32.mrb[16].mxu1 }
 0xc9b   :  { %v1296_v3 = vmul.f32 0.70710677, %v1644_v59  ;;  %v1272_v60 = vpop.f32.mrb[17].mxu1  ;;  %v1292_v11 = vmul.f32 0.5, %v1644_v59 }
 0xc9c   :  { %v1295_v62 = vmul.f32 0.70710677, %v1272_v60  ;;  %v1291_v10 = vmul.f32 0.5, %v1272_v60 }
 0xc9d   :  { %1879 = verf.f32 %v1296_v3 }
 0xc9e   :  { %1881 = verf.f32 %v1295_v62 }
 0xca7   :  { %v1880_v63 = vpop.eup %1879 }
 0xca8   :  { %v1882_v5 = vpop.eup %1881  ;;  %v1304_v9 = vadd.f32 1.0, %v1880_v63 }
 0xca9   :  { %v1303_v2 = vadd.f32 1.0, %v1882_v5 }
 0xcaa   :  { %v1308_v8 = vmul.f32 %v1304_v9, %v1292_v11 }
 0xcab   :  { %v1307_v13 = vmul.f32 %v1303_v2, %v1291_v10 }
 0xcad   :  { %1680 = vmatprep.mubr.f32.mxu0 %v1307_v13 }
 0xcae   :  { %1681 = vmatmul.mubr.f32.vlgmr.msra.gmra.mrb[8].mxu0 %v1308_v8 }
 0xd2a   :  { %v1647_v12 = vpop.f32.mrb[18].mxu1 }
 0xd2b   :  { %v1298_v14 = vmul.f32 0.70710677, %v1647_v12  ;;  %v1282_v16 = vpop.f32.mrb[19].mxu1  ;;  %v1294_v23 = vmul.f32 0.5, %v1647_v12 }
 0xd2c   :  { %v1297_v17 = vmul.f32 0.70710677, %v1282_v16  ;;  %v1293_v21 = vmul.f32 0.5, %v1282_v16 }
 0xd2d   :  { %1883 = verf.f32 %v1298_v14 }
 0xd2e   :  { %1885 = verf.f32 %v1297_v17 }
 0xd37   :  { %v1884_v18 = vpop.eup %1883 }
 0xd38   :  { %v1886_v19 = vpop.eup %1885  ;;  %v1306_v20 = vadd.f32 1.0, %v1884_v18 }
 0xd39   :  { %v1305_v22 = vadd.f32 1.0, %v1886_v19 }
 0xd3a   :  { %v1310_v25 = vmul.f32 %v1306_v20, %v1294_v23 }
 0xd3b   :  { %v1309_v24 = vmul.f32 %v1305_v22, %v1293_v21 }
 0xd3d   :  { %1683 = vmatprep.mubr.f32.mxu0 %v1309_v24 }
 0xd3e   :  { %1684 = vmatmul.mubr.f32.gmra.mrb[10].mxu0 %v1310_v25 }
 0xd81   :  { %v1682_v26 = vpop.f32.mrb[8].mxu0 }
 0xd82   :  { %v1413_v27 = vadd.f32 %v1682_v26, %v2142_v7  ;;  %v1393_v28 = vpop.f32.mrb[9].mxu0 }
 0xd83   :  { %v1412_v29 = vadd.f32 %v1393_v28, %v2137_v6 }
 0xd84   :  { %1417 = vst.msk [vmem:[#allocation2 + $0x8] sm:$0xff] %vm33_vm0, %v1413_v27 }
 0xd85   :  { %1416 = vst.msk [vmem:[#allocation2] sm:$0xff] %vm33_vm0, %v1412_v29 }
 0xe11   :  { %v1685_v30 = vpop.f32.mrb[10].mxu0 }
 0xe12   :  { %v1415_v31 = vadd.f32 %v1685_v30, %v2159_v51  ;;  %v1403_v61 = vpop.f32.mrb[11].mxu0 }
 0xe13   :  { %v1414_v32 = vadd.f32 %v1403_v61, %v2155_v47 }
 0xe14   :  { %1419 = vst.msk [vmem:[#allocation2 + $0x18] sm:$0xff] %vm33_vm0, %v1415_v31 }
 0xe15   :  { %1418 = vst.msk [vmem:[#allocation2 + $0x10] sm:$0xff] %vm33_vm0, %v1414_v32 }
 0xe16   :  { %1898 = shalt.err (!%p1895_p4)
}
 0xe17   :  { %s1899_s18 = scalar_lea.hbm %s2274_s7, 512 }
 0xe18   :  { %p1900_p5 = scmp.ne.s32.totalorder %s2274_s7, %s1899_s18  ;;  %p1903_p6 = scmp.lt.u32.totalorder %s1899_s18, %s2274_s7 }
 0xe1a   :  { %p1905_p7 = pnand %p1903_p6, %p1900_p5 }
 0xe1c   :  { %1908 = shalt.err (!%p1905_p7)
}
 0xe1d   :  { %s1918_s23 = smov 128   ;;  %s1919_s24 = smov 8  }
 0xe1e   :  { %1431 = dma.vmem_to_hbm [thread:$0]  %s1426_s16, 512, %s2274_s7, [#allocation3], %s1918_s23, %s1918_s23, %s1919_s24  }
 0xe1f   :  { %1909 = dma.done.wait [#allocation3], 512  }
 0xe20   :  { %1910 = vsyncadd [#allocation3], 4294966784 }
 0xe21   :  { %1435 = vsyncpa [#allocation3], 1 }

</bundles_post_ra>
